<compile_context>
chip_gen: v6e
topology: v6e:2x2x1
jax: 0.10.0
libtpu: 0.0.40
codegen_flags: <defaults>
</compile_context>

<pallas_src>
import functools

import jax
import jax.numpy as jnp
from jax.experimental import pallas as pl
from jax.experimental.pallas import tpu as pltpu


# --------------------------------------------------------------------------- #
# Mono2D front end (rFFT-domain log-Gabor + Riesz transform)                   #
# --------------------------------------------------------------------------- #

def mono2d_features(x_nchw, mono_params, *, nscale=1, return_phase=True,
                    return_phase_asym=False, eps=1e-12):
    """Monogenic features, channel-first: (N, Cin, H, W) -> (N, Cm, H, W) f32.

    Per scale & input channel emits [local amplitude, local phase]."""
    n, c, h, w = x_nchw.shape
    x = x_nchw.astype(jnp.float32)
    fy = jnp.fft.fftfreq(h)[:, None]                      # (H, 1)
    fx = jnp.fft.rfftfreq(w)[None, :]                     # (1, W//2+1)
    radius = jnp.sqrt(fx * fx + fy * fy)
    radius = radius.at[0, 0].set(1.0)
    riesz1 = (1j * fx) / radius                           # Riesz x  (H, Wr)
    riesz2 = (1j * fy) / radius                           # Riesz y  (H, Wr)

    xf = jnp.fft.rfft2(x, axes=(2, 3))                    # (N, C, H, Wr)

    min_wl = mono_params["min_wavelength"]
    mult = mono_params["mult"]
    sigma_onf = mono_params["sigma_onf"]

    feats = []
    for s in range(nscale):
        f0 = 1.0 / (min_wl * (mult ** s))
        lg = jnp.exp(-(jnp.log(radius / f0) ** 2)
                     / (2.0 * jnp.log(sigma_onf) ** 2))
        lg = lg.at[0, 0].set(0.0)                         # kill DC
        xf_bp = xf * lg[None, None]
        bp = jnp.fft.irfft2(xf_bp, s=(h, w), axes=(2, 3))                    # even
        h1 = jnp.fft.irfft2(xf_bp * riesz1[None, None], s=(h, w), axes=(2, 3))
        h2 = jnp.fft.irfft2(xf_bp * riesz2[None, None], s=(h, w), axes=(2, 3))
        # TODO(synk): eps placement follows a generic monogenic-signal recipe;
        #             verify against the actual Mono2D module implementation.
        odd = jnp.sqrt(h1 * h1 + h2 * h2 + eps)
        amp = jnp.sqrt(bp * bp + h1 * h1 + h2 * h2 + eps)
        feats.append(amp)
        if return_phase:
            feats.append(jnp.arctan2(odd, bp))
        if return_phase_asym:
            feats.append(jnp.maximum(jnp.abs(bp) - odd, 0.0) / (amp + 1e-6))
    return jnp.concatenate(feats, axis=1)                 # (N, Cm, H, W)


# --------------------------------------------------------------------------- #
# Fused Pallas kernel: in-kernel im2col (K=9C fold) + Conv3x3 + LeakyReLU      #
# + Conv1x1, channels-on-sublanes / pixels-on-lanes                            #
# --------------------------------------------------------------------------- #

def _fused_head_kernel(x_ref, w1_ref, b1_ref, w2_ref, b2_ref, o_ref,
                       *, th, Wp, neg_slope):
    # x_ref : (1, 1, C, (th+3)*Wp)  bf16 halo'd row band, pixels on lanes
    # w1_ref: (F, 9*C)  f32         b1_ref: (F, 1)       f32
    # w2_ref: (Cout_p, F) f32       b2_ref: (Cout_p, 1)  f32
    # o_ref : (1, 1, Cout_p, th*Wp) f32   (lane-dense, unmasked stores)
    Lp = th * Wp
    band = x_ref[0, 0].astype(jnp.float32)                # (C, band_len)

    # 9 static lane-offset views of the band = in-kernel im2col.  Output pixel
    # p = y*Wp + x of this tile needs padded pixel (y+dy, x+dx), i.e. band
    # element dy*Wp + dx + p.  Columns x in {W, W+1} are junk (sliced off in
    # the wrapper), so over-reads there are harmless (band has th+3 rows).
    slabs = [band[:, dy * Wp + dx: dy * Wp + dx + Lp]
             for dy in range(3) for dx in range(3)]
    patches = jnp.concatenate(slabs, axis=0)               # (9C, Lp)

    # single K = 9C MXU contraction (instead of 9 K=C matmuls)
    acc = jax.lax.dot_general(
        w1_ref[...], patches,
        dimension_numbers=(((1,), (0,)), ((), ())),
        preferred_element_type=jnp.float32)                # (F, Lp)

    hidden = acc + b1_ref[...]
    hidden = jnp.where(hidden >= 0, hidden, jnp.float32(neg_slope) * hidden)

    logits = jax.lax.dot_general(
        w2_ref[...], hidden,
        dimension_numbers=(((1,), (0,)), ((), ())),
        preferred_element_type=jnp.float32)                # (Cout_p, Lp)
    o_ref[0, 0] = (logits + b2_ref[...]).astype(o_ref.dtype)


def _pick_row_tile(H, Wp, N, lane_target=2048):
    """Largest row tile th dividing H with th*Wp <= lane_target lanes.
    Drops to a smaller divisor if the (N, H//th) grid would expose < 2
    parallel steps (keeps both v7x TensorCores busy)."""
    divisors = [d for d in range(1, H + 1) if H % d == 0]
    fits = [d for d in divisors if d * Wp <= lane_target] or [1]
    th = max(fits)
    if N * (H // th) < 2:
        smaller = [d for d in fits if d < th]
        if smaller:
            th = max(smaller)
    return th


def fused_conv_head(bands, w1_k, b1_k, w2_k, b2_k, *, th, Wp, neg_slope=0.01):
    """bands: (N, n_tiles, C, (th+3)*Wp) bf16.  Returns (N, n_tiles, Cout_p, th*Wp)."""
    N, n_tiles, C, band_len = bands.shape
    F = w1_k.shape[0]
    Cout_p = w2_k.shape[0]
    Lp = th * Wp

    kern = functools.partial(_fused_head_kernel, th=th, Wp=Wp,
                             neg_slope=neg_slope)
    return pl.pallas_call(
        kern,
        out_shape=jax.ShapeDtypeStruct((N, n_tiles, Cout_p, Lp), jnp.float32),
        grid=(N, n_tiles),
        in_specs=[
            # streamed, halo'd row band (double-buffered by the pipeline)
            pl.BlockSpec((1, 1, C, band_len), lambda b, r: (b, r, 0, 0)),
            pl.BlockSpec((F, 9 * C), lambda b, r: (0, 0)),
            pl.BlockSpec((F, 1), lambda b, r: (0, 0)),
            pl.BlockSpec((Cout_p, F), lambda b, r: (0, 0)),
            pl.BlockSpec((Cout_p, 1), lambda b, r: (0, 0)),
        ],
        # lane-dense output: last dim th*Wp, full 8-sublane Cout_p groups
        out_specs=pl.BlockSpec((1, 1, Cout_p, Lp), lambda b, r: (b, r, 0, 0)),
        compiler_params=pltpu.CompilerParams(
            dimension_semantics=("parallel", "parallel")),
    )(bands, w1_k, b1_k, w2_k, b2_k)


# --------------------------------------------------------------------------- #
# MonoModel forward                                                            #
# --------------------------------------------------------------------------- #

def mono_model_forward(x_nchw, params, *, nscale=1, neg_slope=0.01,
                       lane_target=2048):
    # 1) Mono2D front end (XLA FFT; no Pallas FFT primitive)
    feats = mono2d_features(x_nchw, params["mono"], nscale=nscale)  # (N,Cm,H,W)
    n, c, h, w = feats.shape
    wp = w + 2
    th = _pick_row_tile(h, wp, n, lane_target)
    n_tiles = h // th

    # 2) channel-first bf16 features, padded (1 top / 2 bottom / 1 left-right)
    #    and cut into halo'd row bands of th+3 rows, flattened pixels-on-lanes
    xb = feats.astype(jnp.bfloat16)
    xp = jnp.pad(xb, ((0, 0), (0, 0), (1, 2), (1, 1)))    # (N, C, H+3, Wp)
    rows = jnp.arange(n_tiles)[:, None] * th + jnp.arange(th + 3)[None, :]
    bands = xp[:, :, rows, :]                             # (N, C, T, th+3, Wp)
    bands = jnp.transpose(bands, (0, 2, 1, 3, 4)).reshape(
        n, n_tiles, c, (th + 3) * wp)

    # 3) weights: 3x3 kernel folded to (F, 9*C); Cout padded to multiple of 8
    fdim = params["w1"].shape[0]
    ncls = params["w2"].shape[0]
    cout_p = ((ncls + 7) // 8) * 8
    w1_k = jnp.transpose(params["w1"], (0, 2, 3, 1)).reshape(fdim, 9 * c)
    w1_k = w1_k.astype(jnp.float32)
    b1_k = params["b1"].reshape(fdim, 1).astype(jnp.float32)
    w2_k = jnp.zeros((cout_p, fdim), jnp.float32).at[:ncls].set(
        params["w2"].reshape(ncls, fdim).astype(jnp.float32))
    b2_k = jnp.zeros((cout_p, 1), jnp.float32).at[:ncls, 0].set(
        params["b2"].astype(jnp.float32))

    out = fused_conv_head(bands, w1_k, b1_k, w2_k, b2_k,
                          th=th, Wp=wp, neg_slope=neg_slope)
    # (N, T, Cout_p, th*Wp) -> (N, ncls, H, W): small metadata-ish reshuffle
    out = out.reshape(n, n_tiles, cout_p, th, wp)
    out = jnp.transpose(out, (0, 2, 1, 3, 4)).reshape(n, cout_p, h, wp)
    return out[:, :ncls, :, :w]


# --------------------------------------------------------------------------- #
# He init (kaiming_normal_, a=0.01) for the representative wrapped model       #
# --------------------------------------------------------------------------- #

def he_init_conv(key, cout, cin, kh, kw, neg_slope=0.01, dtype=jnp.float32):
    fan_in = cin * kh * kw
    gain = (2.0 / (1.0 + neg_slope ** 2)) ** 0.5
    std = gain / (fan_in ** 0.5)
    w = jax.random.normal(key, (cout, cin, kh, kw), dtype=dtype) * std
    b = jnp.zeros((cout,), dtype=dtype)
    return w, b


# --------------------------------------------------------------------------- #
# Pure-JAX reference of the fused head (same bf16 feature storage, f32 math)   #
# --------------------------------------------------------------------------- #

def reference_head(feats, w1, b1, w2, b2, neg_slope=0.01):
    # feats: (N, C, H, W) f32; emulate the kernel's bf16 feature storage
    xb = feats.astype(jnp.bfloat16).astype(jnp.float32)
    xp = jnp.pad(xb, ((0, 0), (0, 0), (1, 1), (1, 1)))
    n, c, hp, wp = xp.shape
    h, w = hp - 2, wp - 2
    f = w1.shape[0]
    acc = jnp.zeros((n, f, h, w), jnp.float32)
    for dy in range(3):
        for dx in range(3):
            acc = acc + jnp.einsum(
                "nchw,fc->nfhw", xp[:, :, dy:dy + h, dx:dx + w],
                w1[:, :, dy, dx], precision=jax.lax.Precision.HIGHEST)
    hidden = acc + b1.reshape(1, -1, 1, 1)
    hidden = jnp.where(hidden >= 0, hidden, neg_slope * hidden)
    logits = jnp.einsum("nfhw,kf->nkhw", hidden, w2.reshape(w2.shape[0], f),
                        precision=jax.lax.Precision.HIGHEST)
    return logits + b2.reshape(1, -1, 1, 1)


# ----------------------------------- main ---------------------------------- #

if __name__ == "__main__":
    key = jax.random.PRNGKey(0)
    k_x, k_w1, k_w2 = jax.random.split(key, 3)

    N, CIN, H, W = 2, 4, 16, 16
    NSCALE = 1
    C_MONO = CIN * NSCALE * 2          # amplitude + phase per channel per scale
    F, NUM_CLASSES = 32, 3

    x = jax.random.normal(k_x, (N, CIN, H, W), dtype=jnp.float32)

    w1, b1 = he_init_conv(k_w1, F, C_MONO, 3, 3)
    w2, b2 = he_init_conv(k_w2, NUM_CLASSES, F, 1, 1)

    params = {
        "mono": {"min_wavelength": jnp.float32(3.0),     # trainable=True ->
                 "mult": jnp.float32(2.1),               # held as parameters
                 "sigma_onf": jnp.float32(0.55)},
        "w1": w1, "b1": b1, "w2": w2, "b2": b2,
    }

    fwd = jax.jit(mono_model_forward)
    out = jax.block_until_ready(fwd(x, params))

    assert out.shape == (N, NUM_CLASSES, H, W), out.shape
    assert out.dtype == jnp.float32
    assert bool(jnp.all(jnp.isfinite(out)))

    # correctness check of the fused Pallas head against a pure-JAX reference
    feats = mono2d_features(x, params["mono"], nscale=NSCALE)
    ref = reference_head(feats, w1, b1, w2, b2)
    rel_err = float(jnp.max(jnp.abs(out - ref)) / (jnp.max(jnp.abs(ref)) + 1e-6))
    assert rel_err < 1e-2, f"mismatch vs reference: rel err {rel_err}"

    print("KERNEL_OK")
</pallas_src>

<mosaic_0001>
module attributes {stable_mosaic.version = 11 : i64} {
  func.func @_fused_head_kernel(%arg0: i32, %arg1: i32, %arg2: memref<1x1x8x342xbf16, #tpu.memory_space<vmem>>, %arg3: memref<32x72xf32, #tpu.memory_space<vmem>>, %arg4: memref<32x1xf32, #tpu.memory_space<vmem>>, %arg5: memref<8x32xf32, #tpu.memory_space<vmem>>, %arg6: memref<8x1xf32, #tpu.memory_space<vmem>>, %arg7: memref<1x1x8x288xf32, #tpu.memory_space<vmem>>) attributes {dimension_semantics = [#tpu.dimension_semantics<parallel>, #tpu.dimension_semantics<parallel>], iteration_bounds = array<i64: 2, 1>, scalar_prefetch = 0 : i64, scratch_operands = 0 : i64, tpu.core_type = #tpu.core_type<tc>, window_params = [{transform_indices = @transform_0, window_bounds = array<i64: 1, 1, 8, 342>}, {pipeline_mode = #tpu.pipeline_mode<synchronous>, transform_indices = @transform_1, window_bounds = array<i64: 32, 72>}, {pipeline_mode = #tpu.pipeline_mode<synchronous>, transform_indices = @transform_2, window_bounds = array<i64: 32, 1>}, {pipeline_mode = #tpu.pipeline_mode<synchronous>, transform_indices = @transform_3, window_bounds = array<i64: 8, 32>}, {pipeline_mode = #tpu.pipeline_mode<synchronous>, transform_indices = @transform_4, window_bounds = array<i64: 8, 1>}, {transform_indices = @transform_5, window_bounds = array<i64: 1, 1, 8, 288>}]} {
    %c0 = arith.constant 0 : index
    %c0_0 = arith.constant 0 : index
    %c0_1 = arith.constant 0 : index
    %c0_2 = arith.constant 0 : index
    %0 = vector.load %arg2[%c0, %c0_0, %c0_1, %c0_2] : memref<1x1x8x342xbf16, #tpu.memory_space<vmem>>, vector<1x1x8x342xbf16>
    %1 = vector.shape_cast %0 : vector<1x1x8x342xbf16> to vector<8x342xbf16>
    %2 = arith.extf %1 : vector<8x342xbf16> to vector<8x342xf32>
    %3 = vector.extract_strided_slice %2 {offsets = [0, 0], sizes = [8, 288], strides = [1, 1]} : vector<8x342xf32> to vector<8x288xf32>
    %4 = vector.extract_strided_slice %2 {offsets = [0, 1], sizes = [8, 288], strides = [1, 1]} : vector<8x342xf32> to vector<8x288xf32>
    %5 = vector.extract_strided_slice %2 {offsets = [0, 2], sizes = [8, 288], strides = [1, 1]} : vector<8x342xf32> to vector<8x288xf32>
    %6 = vector.extract_strided_slice %2 {offsets = [0, 18], sizes = [8, 288], strides = [1, 1]} : vector<8x342xf32> to vector<8x288xf32>
    %7 = vector.extract_strided_slice %2 {offsets = [0, 19], sizes = [8, 288], strides = [1, 1]} : vector<8x342xf32> to vector<8x288xf32>
    %8 = vector.extract_strided_slice %2 {offsets = [0, 20], sizes = [8, 288], strides = [1, 1]} : vector<8x342xf32> to vector<8x288xf32>
    %9 = vector.extract_strided_slice %2 {offsets = [0, 36], sizes = [8, 288], strides = [1, 1]} : vector<8x342xf32> to vector<8x288xf32>
    %10 = vector.extract_strided_slice %2 {offsets = [0, 37], sizes = [8, 288], strides = [1, 1]} : vector<8x342xf32> to vector<8x288xf32>
    %11 = vector.extract_strided_slice %2 {offsets = [0, 38], sizes = [8, 288], strides = [1, 1]} : vector<8x342xf32> to vector<8x288xf32>
    %12 = tpu.concatenate %3, %4, %5, %6, %7, %8, %9, %10, %11 in 0 : vector<8x288xf32>, vector<8x288xf32>, vector<8x288xf32>, vector<8x288xf32>, vector<8x288xf32>, vector<8x288xf32>, vector<8x288xf32>, vector<8x288xf32>, vector<8x288xf32> -> vector<72x288xf32>
    %c0_3 = arith.constant 0 : index
    %c0_4 = arith.constant 0 : index
    %13 = vector.load %arg3[%c0_3, %c0_4] : memref<32x72xf32, #tpu.memory_space<vmem>>, vector<32x72xf32>
    %cst = arith.constant dense<0.000000e+00> : vector<32x288xf32>
    %14 = tpu.matmul %13, %12, %cst {dimension_numbers = #tpu.dot_dimension_numbers<[1], [0], [0], [1], [0, 0, 1, 1], [], []>} : vector<32x72xf32>, vector<72x288xf32>, vector<32x288xf32> -> vector<32x288xf32>
    %c0_5 = arith.constant 0 : index
    %c0_6 = arith.constant 0 : index
    %15 = vector.load %arg4[%c0_5, %c0_6] : memref<32x1xf32, #tpu.memory_space<vmem>>, vector<32x1xf32>
    %16 = vector.broadcast %15 : vector<32x1xf32> to vector<32x288xf32>
    %17 = arith.addf %14, %16 : vector<32x288xf32>
    %cst_7 = arith.constant 0.000000e+00 : f32
    %18 = vector.broadcast %cst_7 : f32 to vector<32x288xf32>
    %19 = arith.cmpf oge, %17, %18 : vector<32x288xf32>
    %cst_8 = arith.constant 0.00999999977 : f32
    %20 = vector.broadcast %cst_8 : f32 to vector<32x288xf32>
    %21 = arith.mulf %20, %17 : vector<32x288xf32>
    %22 = arith.select %19, %17, %21 : vector<32x288xi1>, vector<32x288xf32>
    %c0_9 = arith.constant 0 : index
    %c0_10 = arith.constant 0 : index
    %23 = vector.load %arg5[%c0_9, %c0_10] : memref<8x32xf32, #tpu.memory_space<vmem>>, vector<8x32xf32>
    %cst_11 = arith.constant dense<0.000000e+00> : vector<8x288xf32>
    %24 = tpu.matmul %23, %22, %cst_11 {dimension_numbers = #tpu.dot_dimension_numbers<[1], [0], [0], [1], [0, 0, 1, 1], [], []>} : vector<8x32xf32>, vector<32x288xf32>, vector<8x288xf32> -> vector<8x288xf32>
    %c0_12 = arith.constant 0 : index
    %c0_13 = arith.constant 0 : index
    %25 = vector.load %arg6[%c0_12, %c0_13] : memref<8x1xf32, #tpu.memory_space<vmem>>, vector<8x1xf32>
    %26 = vector.broadcast %25 : vector<8x1xf32> to vector<8x288xf32>
    %27 = arith.addf %24, %26 : vector<8x288xf32>
    %c0_14 = arith.constant 0 : index
    %c0_15 = arith.constant 0 : index
    %c0_16 = arith.constant 0 : index
    %c0_17 = arith.constant 0 : index
    %28 = vector.load %arg7[%c0_14, %c0_15, %c0_16, %c0_17] : memref<1x1x8x288xf32, #tpu.memory_space<vmem>>, vector<1x1x8x288xf32>
    %29 = vector.shape_cast %28 : vector<1x1x8x288xf32> to vector<8x288xf32>
    %30 = vector.shape_cast %27 : vector<8x288xf32> to vector<1x1x8x288xf32>
    tpu.vector_store %arg7[%c0_14, %c0_15, %c0_16, %c0_17], %30 {strides = array<i32>} : memref<1x1x8x288xf32, #tpu.memory_space<vmem>>, vector<1x1x8x288xf32>,
    return
  }
  func.func @transform_0(%arg0: i32, %arg1: i32) -> (i32, i32, i32, i32) {
    %c0_i32 = arith.constant 0 : i32
    %c0_i32_0 = arith.constant 0 : i32
    %c0_i32_1 = arith.constant 0 : i32
    return %arg0, %arg1, %c0_i32, %c0_i32_0 : i32, i32, i32, i32
  }
  func.func @transform_1(%arg0: i32, %arg1: i32) -> (i32, i32) {
    %c0_i32 = arith.constant 0 : i32
    %c0_i32_0 = arith.constant 0 : i32
    %c0_i32_1 = arith.constant 0 : i32
    return %c0_i32, %c0_i32_0 : i32, i32
  }
  func.func @transform_2(%arg0: i32, %arg1: i32) -> (i32, i32) {
    %c0_i32 = arith.constant 0 : i32
    %c0_i32_0 = arith.constant 0 : i32
    %c0_i32_1 = arith.constant 0 : i32
    return %c0_i32, %c0_i32_0 : i32, i32
  }
  func.func @transform_3(%arg0: i32, %arg1: i32) -> (i32, i32) {
    %c0_i32 = arith.constant 0 : i32
    %c0_i32_0 = arith.constant 0 : i32
    %c0_i32_1 = arith.constant 0 : i32
    return %c0_i32, %c0_i32_0 : i32, i32
  }
  func.func @transform_4(%arg0: i32, %arg1: i32) -> (i32, i32) {
    %c0_i32 = arith.constant 0 : i32
    %c0_i32_0 = arith.constant 0 : i32
    %c0_i32_1 = arith.constant 0 : i32
    return %c0_i32, %c0_i32_0 : i32, i32
  }
  func.func @transform_5(%arg0: i32, %arg1: i32) -> (i32, i32, i32, i32) {
    %c0_i32 = arith.constant 0 : i32
    %c0_i32_0 = arith.constant 0 : i32
    %c0_i32_1 = arith.constant 0 : i32
    return %arg0, %arg1, %c0_i32, %c0_i32_0 : i32, i32, i32, i32
  }
}

</mosaic_0001>

<bundles_post_ra>
// kernel: reverse.9
= control target key start
LH: loop header
LB: loop body
LE: loop exit
PB: predicated region body
PF: predicated region fallthrough
CT: control target
= control target key end

     0   :  { %v72_v3 = vlaneseq  ;;  %v65_v9 = vld [vmem:[#allocation0 + $0x7] ss:$-1 sm:$0xff]  ;;  %v79_v12 = vld [vmem:[#allocation0 + $0x17] ss:$-1 sm:$0xff]  ;;  %s331_s0 = inlined_call_operand.vmem [shape: f32[2,4,16,7], index: 0, kind: input, shape index: {}]   ;;  %s332_s1 = inlined_call_operand.vmem [shape: f32[2,4,16,7], index: 1, kind: output, shape index: {}]  }
   0x1   :  { %v45_v0 = vld [vmem:[%s331_s0] sm:$0xff]  ;;  %v47_v1 = vld [vmem:[%s331_s0 + $0x8] sm:$0xff]  ;;  %v49_v2 = vld [vmem:[%s331_s0 + $0x10] sm:$0xff]  ;;  %v66_v10 = vrot.slane %v65_v9, 1  ;;  %v80_v14 = vrot.slane %v79_v12, 1 }
   0x2   :  { %46 = vst [vmem:[#allocation0 + $0x8] sm:$0xff] %v45_v0  ;;  %48 = vst [vmem:[#allocation0 + $0x18] sm:$0xff] %v47_v1  ;;  %v51_v4 = vld [vmem:[%s331_s0 + $0x18] sm:$0xff]  ;;  %v53_v5 = vld [vmem:[%s331_s0 + $0x20] sm:$0xff]  ;;  %v73_v11 = vshrl.u32 %v72_v3, 7 }
   0x3   :  { %50 = vst [vmem:[#allocation0 + $0x28] sm:$0xff] %v49_v2  ;;  %v55_v6 = vld [vmem:[%s331_s0 + $0x28] sm:$0xff]  ;;  %52 = vst [vmem:[#allocation0 + $0x38] sm:$0xff] %v51_v4  ;;  %v57_v7 = vld [vmem:[%s331_s0 + $0x30] sm:$0xff] }
   0x4   :  { %54 = vst [vmem:[#allocation0 + $0x48] sm:$0xff] %v53_v5  ;;  %56 = vst [vmem:[#allocation0 + $0x58] sm:$0xff] %v55_v6  ;;  %v59_v8 = vld [vmem:[%s331_s0 + $0x38] sm:$0xff]  ;;  %v93_v13 = vld [vmem:[#allocation0 + $0x27] ss:$-1 sm:$0xff]  ;;  %vm74_vm0 = vcmp.lt.s32.totalorder %v73_v11, 7 }
   0x5   :  { %58 = vst [vmem:[#allocation0 + $0x68] sm:$0xff] %v57_v7  ;;  %60 = vst [vmem:[#allocation0 + $0x78] sm:$0xff] %v59_v8  ;;  %v94_v15 = vrot.slane %v93_v13, 1  ;;  %v107_v16 = vld [vmem:[#allocation0 + $0x37] ss:$-1 sm:$0xff] }
   0x6   :  { %67 = vst [vmem:[#allocation1] sm:$0xff] %v66_v10  ;;  %v108_v17 = vrot.slane %v107_v16, 1  ;;  %v121_v18 = vld [vmem:[#allocation0 + $0x47] ss:$-1 sm:$0xff]  ;;  %v135_v19 = vld [vmem:[#allocation0 + $0x57] ss:$-1 sm:$0xff] }
   0x7   :  { %81 = vst [vmem:[#allocation1 + $0x8] sm:$0xff] %v80_v14  ;;  %95 = vst [vmem:[#allocation1 + $0x10] sm:$0xff] %v94_v15  ;;  %v122_v20 = vrot.slane %v121_v18, 1  ;;  %v136_v21 = vrot.slane %v135_v19, 1  ;;  %v149_v22 = vld [vmem:[#allocation0 + $0x67] ss:$-1 sm:$0xff] }
   0x8   :  { %v163_v23 = vld [vmem:[#allocation0 + $0x77] ss:$-1 sm:$0xff]  ;;  %109 = vst [vmem:[#allocation1 + $0x18] sm:$0xff] %v108_v17  ;;  %v150_v24 = vrot.slane %v149_v22, 1 }
   0x9   :  { %v164_v25 = vrot.slane %v163_v23, 1  ;;  %v70_v26 = vld [vmem:[#allocation0 + $0xf] ss:$-1 sm:$0xff]  ;;  %v84_v27 = vld [vmem:[#allocation0 + $0x1f] ss:$-1 sm:$0xff]  ;;  %123 = vst [vmem:[#allocation1 + $0x20] sm:$0xff] %v122_v20 }
   0xa   :  { %v98_v28 = vld [vmem:[#allocation0 + $0x2f] ss:$-1 sm:$0xff]  ;;  %137 = vst [vmem:[#allocation1 + $0x28] sm:$0xff] %v136_v21  ;;  %v71_v29 = vrot.slane %v70_v26, 1  ;;  %v85_v30 = vrot.slane %v84_v27, 1  ;;  %151 = vst [vmem:[#allocation1 + $0x30] sm:$0xff] %v150_v24 }
   0xb   :  { %v99_v31 = vrot.slane %v98_v28, 1  ;;  %v112_v32 = vld [vmem:[#allocation0 + $0x3f] ss:$-1 sm:$0xff]  ;;  %165 = vst [vmem:[#allocation1 + $0x38] sm:$0xff] %v164_v25  ;;  %v126_v34 = vld [vmem:[#allocation0 + $0x4f] ss:$-1 sm:$0xff] }
   0xc   :  { %v113_v33 = vrot.slane %v112_v32, 1  ;;  %v140_v35 = vld [vmem:[#allocation0 + $0x5f] ss:$-1 sm:$0xff]  ;;  %75 = vst.msk [vmem:[#allocation1] sm:$0xff] %vm74_vm0, %v71_v29  ;;  %89 = vst.msk [vmem:[#allocation1 + $0x8] sm:$0xff] %vm74_vm0, %v85_v30  ;;  %v127_v36 = vrot.slane %v126_v34, 1 }
   0xd   :  { %103 = vst.msk [vmem:[#allocation1 + $0x10] sm:$0xff] %vm74_vm0, %v99_v31  ;;  %v141_v37 = vrot.slane %v140_v35, 1  ;;  %v154_v38 = vld [vmem:[#allocation0 + $0x6f] ss:$-1 sm:$0xff]  ;;  %v168_v39 = vld [vmem:[#allocation0 + $0x7f] ss:$-1 sm:$0xff] }
   0xe   :  { %117 = vst.msk [vmem:[#allocation1 + $0x18] sm:$0xff] %vm74_vm0, %v113_v33  ;;  %v155_v40 = vrot.slane %v154_v38, 1  ;;  %v169_v41 = vrot.slane %v168_v39, 1  ;;  %131 = vst.msk [vmem:[#allocation1 + $0x20] sm:$0xff] %vm74_vm0, %v127_v36 }
   0xf   :  { %145 = vst.msk [vmem:[#allocation1 + $0x28] sm:$0xff] %vm74_vm0, %v141_v37 }
  0x10   :  { %159 = vst.msk [vmem:[#allocation1 + $0x30] sm:$0xff] %vm74_vm0, %v155_v40  ;;  %173 = vst.msk [vmem:[#allocation1 + $0x38] sm:$0xff] %vm74_vm0, %v169_v41 }
  0x13   :  { %v216_v42 = vld [vmem:[#allocation1] sm:$0xff]  ;;  %v218_v43 = vld [vmem:[#allocation1 + $0x8] sm:$0xff] }
  0x14   :  { %v220_v44 = vld [vmem:[#allocation1 + $0x10] sm:$0xff]  ;;  %217 = vst [vmem:[%s332_s1] sm:$0xff] %v216_v42  ;;  %219 = vst [vmem:[%s332_s1 + $0x8] sm:$0xff] %v218_v43 }
  0x15   :  { %221 = vst [vmem:[%s332_s1 + $0x10] sm:$0xff] %v220_v44  ;;  %v222_v45 = vld [vmem:[#allocation1 + $0x18] sm:$0xff]  ;;  %v224_v46 = vld [vmem:[#allocation1 + $0x20] sm:$0xff] }
  0x16   :  { %223 = vst [vmem:[%s332_s1 + $0x18] sm:$0xff] %v222_v45  ;;  %v226_v47 = vld [vmem:[#allocation1 + $0x28] sm:$0xff]  ;;  %225 = vst [vmem:[%s332_s1 + $0x20] sm:$0xff] %v224_v46 }
  0x17   :  { %227 = vst [vmem:[%s332_s1 + $0x28] sm:$0xff] %v226_v47  ;;  %v228_v48 = vld [vmem:[#allocation1 + $0x30] sm:$0xff]  ;;  %v230_v49 = vld [vmem:[#allocation1 + $0x38] sm:$0xff] }
  0x18   :  { %229 = vst [vmem:[%s332_s1 + $0x30] sm:$0xff] %v228_v48  ;;  %231 = vst [vmem:[%s332_s1 + $0x38] sm:$0xff] %v230_v49 }

// kernel: mono_model_forward.1
= control target key start
LH: loop header
LB: loop body
LE: loop exit
PB: predicated region body
PF: predicated region fallthrough
CT: control target
= control target key end

     0   :  { %s1079_s18 = smov 0   ;;  %s1081_s19 = smov 0   ;;  %s1195_s0 = inlined_call_operand.vmem [shape: bf16[2,1,8,342], index: 0, kind: input, shape index: {}]   ;;  %s1196_s1 = inlined_call_operand.vmem [shape: f32[32,72], index: 1, kind: input, shape index: {}]   ;;  %s1197_s2 = inlined_call_operand.vmem [shape: f32[32,1], index: 2, kind: input, shape index: {}]   ;;  %s1198_s3 = inlined_call_operand.vmem [shape: f32[8,32], index: 3, kind: input, shape index: {}]   ;;  %s1199_s4 = inlined_call_operand.vmem [shape: f32[8,1], index: 4, kind: input, shape index: {}]   ;;  %s1200_s5 = inlined_call_operand.vmem [shape: f32[2,1,8,288], index: 5, kind: output, shape index: {}]  }
   0x1   :  { %s1083_s20 = smov 0  }
   0x2 LB: > { %s27_s21 = sadd.s32 1, %s1032_s19  ;;  %p867_p0 = scmp.ge.s32.totalorder %s1036_s20, 1  ;;  %s1036_s20 = sphi %s1083_s20, %s15_s20   ;;  %s1032_s19 = sphi %s1081_s19, %s1202_s19   ;;  %s1028_s18 = sphi %s1079_s18, %s1201_s18  }
   0x3   : > { %p29_p1 = scmp.ge.s32.totalorder %s27_s21, 2  ;;  %p207_p2 = scmp.lt.s32.totalorder %s1036_s20, 3 }
   0x5   : > { %s1204_s21 = smov (%p29_p1, %s27_s21), 0  ;;  %p208_p3 = pnand %p867_p0, %p207_p2 }
   0x6   : > { %p243_p4 = scmp.lt.s32.totalorder (!%p208_p3), %s1028_s18, 1  ;;  %s1038_s26 = smov (!%p208_p3), 90  }
   0x7   : > { %211 = sbr.rel (%p208_p3) target bundleno = 589 (0x24d), region = 40  ;;  %s1039_s27 = smov (!%p208_p3), 91  }
   0x8   : > { %s1040_s28 = smov (!%p208_p3), 92   ;;  %s1041_s29 = smov (!%p208_p3), 108  }
   0x9   : > { %s1042_s30 = smov (!%p208_p3), 109   ;;  %s1043_s8 = smov (!%p208_p3), 110  }
   0xa   : > { %s1045_s9 = smov (!%p208_p3), 126   ;;  %s1046_s10 = smov (!%p208_p3), 127  }
   0xc   : > { %s1206_s18 = smov (!%p243_p4, %s1028_s18), 1  ;;  %v1122_v6 = vld [vmem:[%s1196_s1] sm:$0xff]  ;;  %vm393_vm0 = vcmask 588800   ;;  %v1044_v7 = vmov 0.0   ;;  %v372_v8 = vld [vmem:[%s1197_s2 + $0x18] sm:$0xff]  ;;  %v371_v9 = vld [vmem:[%s1197_s2 + $0x10] sm:$0xff] }
   0xd   : > { %s935_s22 = smul.u32 12, %s1206_s18  ;;  %918 = vmatprep.mubr.msk.f32.mxu1 %vm393_vm0, %v1122_v6  ;;  %470 = vmatprep.mubr.f32.mxu0 %v1044_v7  ;;  %v1047_v10 = vmov 0   ;;  %v369_v11 = vld [vmem:[%s1197_s2] sm:$0xff]  ;;  %v370_v12 = vld [vmem:[%s1197_s2 + $0x8] sm:$0xff]  ;;  %vm359_vm1 = vcmask 736256   ;;  %vm347_vm2 = vcmask 744448  }
   0xe   : > { %1012 = vset.pattern.permute.xlu0 %v1047_v10  ;;  %1013 = vset.pattern.permute.xlu1 %v1047_v10  ;;  %v617_v13 = vld [vmem:[%s1199_s4] sm:$0xff]  ;;  %vm335_vm3 = vcmask 752640   ;;  %vm323_vm4 = vcmask 883712   ;;  %vm311_vm5 = vcmask 891904   ;;  %vm299_vm6 = vcmask 900096   ;;  %v366_v62 = vld [vmem:[%s1196_s1 + $0x8] sm:$0xff] }
   0xf   : > { %s251_s25 = scalar_lea.vmem %s1195_s0, %s935_s22  ;;  %vm287_vm7 = vcmask 1031168   ;;  %vm275_vm8 = vcmask 1039360   ;;  %v367_v63 = vld [vmem:[%s1196_s1 + $0x10] sm:$0xff]  ;;  %vm1048_vm9 = vmmov 0   ;;  %vm623_vm14 = vcmask 261120  }
  0x10   : > { %v1103_v0 = vld [vmem:[%s251_s25] sm:$0xff]  ;;  %v262_v1 = vld [vmem:[%s251_s25 + $0x8] sm:$0xf] }
  0x11   : > { %v264_v2 = vunpack.c.h.bf16 %v1103_v0  ;;  %v1106_v3 = vunpack.c.l.bf16 %v262_v1  ;;  %v1112_v5 = vunpack.c.l.bf16 %v1103_v0  ;;  %v368_v1 = vld [vmem:[%s1196_s1 + $0x18] sm:$0xff] }
  0x13   : > { %v972_v4 = vpack.i.bf16 %v1106_v3, %v264_v2 }
  0x15   : > { %973 = vrot.lane.b32.xlu0 %v972_v4, %s1038_s26  ;;  %978 = vrot.lane.b32.xlu1 %v972_v4, %s1039_s27 }
  0x19   : > { %353 = vrot.lane.b32.xlu0 %v1112_v5, %s1038_s26  ;;  %341 = vrot.lane.b32.xlu1 %v1112_v5, %s1039_s27 }
  0x1d   : > { %983 = vrot.lane.b32.xlu0 %v972_v4, %s1040_s28  ;;  %329 = vrot.lane.b32.xlu1 %v1112_v5, %s1040_s28 }
  0x21   : > { %988 = vrot.lane.b32.xlu0 %v972_v4, %s1041_s29  ;;  %317 = vrot.lane.b32.xlu1 %v1112_v5, %s1041_s29 }
  0x25   : > { %993 = vrot.lane.b32.xlu0 %v972_v4, %s1042_s30  ;;  %305 = vrot.lane.b32.xlu1 %v1112_v5, %s1042_s30 }
  0x29   : > { %998 = vrot.lane.b32.xlu0 %v972_v4, %s1043_s8  ;;  %293 = vrot.lane.b32.xlu1 %v1112_v5, %s1043_s8  ;;  %s936_s8 = smul.u32 24, %s1206_s18 }
  0x2b   : > { %s260_s11 = scalar_lea.vmem %s1200_s5, %s936_s8 }
  0x2d   : > { %1003 = vrot.lane.b32.xlu0 %v972_v4, %s1045_s9  ;;  %281 = vrot.lane.b32.xlu1 %v1112_v5, %s1045_s9 }
  0x31   : > { %1008 = vrot.lane.b32.xlu0 %v972_v4, %s1046_s10  ;;  %269 = vrot.lane.b32.xlu1 %v1112_v5, %s1046_s10 }
  0x35   : > { %390 = vperm.xlu0 %1012, %v372_v8   ;;  %385 = vperm.xlu1 %1013, %v371_v9  }
  0x39   : > { %375 = vperm.xlu0 %1012, %v369_v11   ;;  %380 = vperm.xlu1 %1013, %v370_v12  }
  0x3d   : > { %620 = vperm.xlu1 %1013, %v617_v13  }
  0x87   : > { %v974_v14 = vpop.permute.xlu0 %973  ;;  %v979_v15 = vpop.permute.xlu1 %978 }
  0x88   : > { %v976_v16 = vunpack.i.h.bf16 %v974_v14  ;;  %v975_v17 = vunpack.i.l.bf16 %v974_v14  ;;  %v981_v18 = vunpack.i.h.bf16 %v979_v15  ;;  %v980_v19 = vunpack.i.l.bf16 %v979_v15 }
  0x8a   : > { %900 = vmatprep.subr.mxu1 %v976_v16  ;;  %v361_v20 = vsel %vm359_vm1, %v975_v17, %v976_v16  ;;  %v349_v23 = vsel %vm347_vm2, %v980_v19, %v981_v18 }
  0x8b   : > { %420 = vmatprep.subr.mxu0 %v361_v20  ;;  %901 = vmatpush3.msra.mxu1 %v976_v16  ;;  %v354_v21 = vpop.permute.xlu0 %353  ;;  %v342_v22 = vpop.permute.xlu1 %341 }
  0x8c   : > { %902 = vmatprep.subr.mxu1 %v981_v18  ;;  %v360_v24 = vsel %vm359_vm1, %v354_v21, %v975_v17  ;;  %v348_v25 = vsel %vm347_vm2, %v342_v22, %v980_v19 }
  0x8d   : > { %421 = vmatpush1.msra.mxu0 %v360_v24  ;;  %903 = vmatpush3.msra.mxu1 %v981_v18 }
  0x8e   : > { %422 = vmatprep.subr.mxu0 %v349_v23 }
  0x8f   : > { %423 = vmatpush1.msra.mxu0 %v348_v25  ;;  %v984_v26 = vpop.permute.xlu0 %983  ;;  %v330_v27 = vpop.permute.xlu1 %329 }
  0x90   : > { %v986_v28 = vunpack.i.h.bf16 %v984_v26  ;;  %v985_v29 = vunpack.i.l.bf16 %v984_v26 }
  0x92   : > { %904 = vmatprep.subr.mxu1 %v986_v28  ;;  %v337_v30 = vsel %vm335_vm3, %v985_v29, %v986_v28  ;;  %v336_v31 = vsel %vm335_vm3, %v330_v27, %v985_v29 }
  0x93   : > { %v989_v32 = vpop.permute.xlu0 %988  ;;  %424 = vmatprep.subr.mxu0 %v337_v30  ;;  %905 = vmatpush3.msra.mxu1 %v986_v28  ;;  %v318_v33 = vpop.permute.xlu1 %317 }
  0x94   : > { %v991_v34 = vunpack.i.h.bf16 %v989_v32  ;;  %v990_v35 = vunpack.i.l.bf16 %v989_v32  ;;  %425 = vmatpush1.msra.mxu0 %v336_v31  ;;  %v616_v31 = vld [vmem:[%s1198_s3] sm:$0xff] }
  0x96   : > { %906 = vmatprep.subr.mxu1 %v991_v34  ;;  %v325_v36 = vsel %vm323_vm4, %v990_v35, %v991_v34  ;;  %v324_v37 = vsel %vm323_vm4, %v318_v33, %v990_v35 }
  0x97   : > { %v994_v38 = vpop.permute.xlu0 %993  ;;  %426 = vmatprep.subr.mxu0 %v325_v36  ;;  %907 = vmatpush3.msra.mxu1 %v991_v34  ;;  %v306_v39 = vpop.permute.xlu1 %305 }
  0x98   : > { %v996_v40 = vunpack.i.h.bf16 %v994_v38  ;;  %v995_v41 = vunpack.i.l.bf16 %v994_v38  ;;  %427 = vmatpush1.msra.mxu0 %v324_v37 }
  0x9a   : > { %908 = vmatprep.subr.mxu1 %v996_v40  ;;  %v313_v42 = vsel %vm311_vm5, %v995_v41, %v996_v40  ;;  %v312_v43 = vsel %vm311_vm5, %v306_v39, %v995_v41 }
  0x9b   : > { %v999_v44 = vpop.permute.xlu0 %998  ;;  %428 = vmatprep.subr.mxu0 %v313_v42  ;;  %909 = vmatpush3.msra.mxu1 %v996_v40  ;;  %v294_v45 = vpop.permute.xlu1 %293 }
  0x9c   : > { %v1001_v46 = vunpack.i.h.bf16 %v999_v44  ;;  %v1000_v47 = vunpack.i.l.bf16 %v999_v44  ;;  %429 = vmatpush1.msra.mxu0 %v312_v43 }
  0x9e   : > { %910 = vmatprep.subr.mxu1 %v1001_v46  ;;  %v301_v48 = vsel %vm299_vm6, %v1000_v47, %v1001_v46  ;;  %v300_v49 = vsel %vm299_vm6, %v294_v45, %v1000_v47 }
  0x9f   : > { %v1004_v50 = vpop.permute.xlu0 %1003  ;;  %430 = vmatprep.subr.mxu0 %v301_v48  ;;  %911 = vmatpush3.msra.mxu1 %v1001_v46  ;;  %v282_v51 = vpop.permute.xlu1 %281 }
  0xa0   : > { %v1006_v52 = vunpack.i.h.bf16 %v1004_v50  ;;  %v1005_v53 = vunpack.i.l.bf16 %v1004_v50  ;;  %431 = vmatpush1.msra.mxu0 %v300_v49 }
  0xa2   : > { %912 = vmatprep.subr.mxu1 %v1006_v52  ;;  %v289_v54 = vsel %vm287_vm7, %v1005_v53, %v1006_v52  ;;  %v288_v55 = vsel %vm287_vm7, %v282_v51, %v1005_v53 }
  0xa3   : > { %v1009_v56 = vpop.permute.xlu0 %1008  ;;  %432 = vmatprep.subr.mxu0 %v289_v54  ;;  %913 = vmatpush3.msra.mxu1 %v1006_v52  ;;  %v270_v57 = vpop.permute.xlu1 %269 }
  0xa4   : > { %v1011_v58 = vunpack.i.h.bf16 %v1009_v56  ;;  %v1010_v59 = vunpack.i.l.bf16 %v1009_v56  ;;  %433 = vmatpush1.msra.mxu0 %v288_v55 }
  0xa6   : > { %914 = vmatprep.subr.mxu1 %v1011_v58  ;;  %v277_v60 = vsel %vm275_vm8, %v1010_v59, %v1011_v58  ;;  %v276_v61 = vsel %vm275_vm8, %v270_v57, %v1010_v59 }
  0xa7   : > { %434 = vmatprep.subr.mxu0 %v277_v60  ;;  %915 = vmatpush3.msra.mxu1 %v1011_v58 }
  0xa8   : > { %435 = vmatpush1.msra.mxu0 %v276_v61  ;;  %916 = vmatprep.subr.mxu1 %v1106_v3 }
  0xa9   : > { %436 = vmatprep.subr.mxu0 %v264_v2  ;;  %917 = vmatpush3.msra.mxu1 %v1106_v3 }
  0xaa   : > { %437 = vmatpush1.msra.mxu0 %v1112_v5  ;;  %919 = vmatmul.mubr.msk.f32.vlgmr.msra.gmra.mxu1 %vm393_vm0, %v366_v62 }
  0xab   : > { %870 = vmatmul.mubr.msk.f32.vlgmr.msra.gmra.mxu0 %vm393_vm0, %v1122_v6  ;;  %921 = vmatprep.mubr.msk.f32.mxu1 %vm393_vm0, %v367_v63 }
  0xac   : > { %476 = vmatprep.mubr.f32.mxu0 %v1044_v7  ;;  %924 = vmatprep.subr.mxu0 %v1044_v7 }
  0xae   : > { %922 = vmatmul.mubr.msk.f32.gmra.mxu1 %vm393_vm0, %v368_v1 }
  0xaf   : > { %871 = vmatmul.mubr.msk.f32.gmra.mxu0 %vm393_vm0, %v366_v62  ;;  %691 = vmatprep.mubr.f32.mxu1 %v1044_v7 }
  0xb0   : > { %482 = vmatprep.mubr.f32.mxu0 %v1044_v7  ;;  %v386_v0 = vpop.permute.xlu1 %385  ;;  %v391_v2 = vpop.permute.xlu0 %390 }
  0xb3   : > { %872 = vmatmul.mubr.msk.f32.gmra.mxu0 %vm393_vm0, %v367_v63 }
  0xb4   : > { %488 = vmatprep.mubr.f32.mxu0 %v1044_v7  ;;  %v381_v6 = vpop.permute.xlu1 %380  ;;  %v376_v10 = vpop.permute.xlu0 %375 }
  0xb7   : > { %873 = vmatmul.mubr.msk.f32.gmra.mxu0 %vm393_vm0, %v368_v1 }
  0xb8   : > { %932 = vmatprep.mubr.msk.f32.mxu0 %vm1048_vm9, %v1044_v7  ;;  %v621_v54 = vpop.permute.xlu1 %620 }
 0x16a   : > { %v920_v3 = vpop.f32.mrf.mxu1 }
 0x16b   : > { %v472_v4 = vpop.f32.mrf.mxu0  ;;  %v567_v9 = vadd.f32 %v920_v3, %v381_v6 }
 0x16c   : > { %v561_v5 = vpop.f32.mrf.mxu1  ;;  %v473_v41 = vadd.f32 %v472_v4, %v376_v10 }
 0x16d   : > { %v474_v8 = vpop.f32.mrf.mxu0  ;;  %v562_v12 = vadd.f32 %v561_v5, %v376_v10  ;;  %v597_v19 = vmul.f32 0.01, %v567_v9  ;;  %vm585_vm11 = vcmp.ge.f32.partialorder %v567_v9, 0.0 }
 0x16e   : > { %v923_v11 = vpop.f32.mrf.mxu1  ;;  %v475_v36 = vadd.f32 %v474_v8, %v376_v10  ;;  %v592_v48 = vmul.f32 0.01, %v473_v41  ;;  %vm580_vm6 = vcmp.ge.f32.partialorder %v473_v41, 0.0 }
 0x16f   : > { %v577_v13 = vadd.f32 %v923_v11, %v391_v2  ;;  %v478_v14 = vpop.f32.mrf.mxu0  ;;  %v594_v20 = vmul.f32 0.01, %v562_v12  ;;  %vm582_vm13 = vcmp.ge.f32.partialorder %v562_v12, 0.0  ;;  %v609_v26 = vsel %vm585_vm11, %v567_v9, %v597_v19 }
 0x170   : > { %v571_v15 = vpop.f32.mrf.mxu1  ;;  %v479_v37 = vadd.f32 %v478_v14, %v381_v6  ;;  %v593_v46 = vmul.f32 0.01, %v475_v36  ;;  %vm581_vm5 = vcmp.ge.f32.partialorder %v475_v36, 0.0  ;;  %v604_v53 = vsel %vm580_vm6, %v473_v41, %v592_v48 }
 0x171   : > { %vm591_vm10 = vcmp.ge.f32.partialorder %v577_v13, 0.0  ;;  %v603_v16 = vmul.f32 0.01, %v577_v13  ;;  %v572_v17 = vadd.f32 %v571_v15, %v386_v0  ;;  %v480_v18 = vpop.f32.mrf.mxu0  ;;  %v606_v28 = vsel %vm582_vm13, %v562_v12, %v594_v20 }
 0x172   : > { %v481_v34 = vadd.f32 %v480_v18, %v381_v6  ;;  %v595_v45 = vmul.f32 0.01, %v479_v37  ;;  %vm583_vm4 = vcmp.ge.f32.partialorder %v479_v37, 0.0  ;;  %v605_v52 = vsel %vm581_vm5, %v475_v36, %v593_v46 }
 0x173   : > { %vm588_vm12 = vcmp.ge.f32.partialorder %v572_v17, 0.0  ;;  %v600_v21 = vmul.f32 0.01, %v572_v17  ;;  %v484_v22 = vpop.f32.mrf.mxu0  ;;  %v615_v23 = vsel %vm591_vm10, %v577_v13, %v603_v16 }
 0x174   : > { %925 = vmatpush3.msra.mxu0 %v615_v23  ;;  %v485_v32 = vadd.f32 %v484_v22, %v386_v0  ;;  %v596_v43 = vmul.f32 0.01, %v481_v34  ;;  %vm584_vm3 = vcmp.ge.f32.partialorder %v481_v34, 0.0  ;;  %v607_v51 = vsel %vm583_vm4, %v479_v37, %v595_v45 }
 0x175   : > { %v486_v24 = vpop.f32.mrf.mxu0  ;;  %926 = vmatprep.subr.mxu0 %v1044_v7  ;;  %v612_v25 = vsel %vm588_vm12, %v572_v17, %v600_v21 }
 0x176   : > { %927 = vmatpush3.msra.mxu0 %v612_v25  ;;  %v487_v29 = vadd.f32 %v486_v24, %v386_v0  ;;  %v598_v42 = vmul.f32 0.01, %v485_v32  ;;  %vm586_vm2 = vcmp.ge.f32.partialorder %v485_v32, 0.0  ;;  %v608_v50 = vsel %vm584_vm3, %v481_v34, %v596_v43 }
 0x177   : > { %v490_v27 = vpop.f32.mrf.mxu0  ;;  %928 = vmatprep.subr.mxu0 %v1044_v7 }
 0x178   : > { %v491_v30 = vadd.f32 %v490_v27, %v391_v2  ;;  %929 = vmatpush3.msra.mxu0 %v609_v26  ;;  %v599_v39 = vmul.f32 0.01, %v487_v29  ;;  %vm587_vm1 = vcmp.ge.f32.partialorder %v487_v29, 0.0  ;;  %v610_v49 = vsel %vm586_vm2, %v485_v32, %v598_v42 }
 0x179   : > { %v492_v33 = vpop.f32.mrf.mxu0  ;;  %930 = vmatprep.subr.mxu0 %v1044_v7 }
 0x17a   : > { %v493_v35 = vadd.f32 %v492_v33, %v391_v2  ;;  %931 = vmatpush3.msra.mxu0 %v606_v28  ;;  %v601_v38 = vmul.f32 0.01, %v491_v30  ;;  %vm589_vm15 = vcmp.ge.f32.partialorder %v491_v30, 0.0  ;;  %v611_v47 = vsel %vm587_vm1, %v487_v29, %v599_v39 }
 0x17b   : > { %933 = vmatmul.mubr.msk.f32.vlgmr.msra.gmra.mxu0 %vm623_vm14, %v616_v31 }
 0x17c   : > { %v602_v40 = vmul.f32 0.01, %v493_v35  ;;  %vm590_vm0 = vcmp.ge.f32.partialorder %v493_v35, 0.0  ;;  %v613_v7 = vsel %vm589_vm15, %v491_v30, %v601_v38 }
 0x17e   : > { %v614_v44 = vsel %vm590_vm0, %v493_v35, %v602_v40 }
 0x17f   : > { %651 = vmatprep.subr.mxu1 %v614_v44 }
 0x180   : > { %652 = vmatpush1.msra.mxu1 %v613_v7 }
 0x181   : > { %653 = vmatprep.subr.mxu1 %v611_v47 }
 0x182   : > { %654 = vmatpush1.msra.mxu1 %v610_v49 }
 0x183   : > { %655 = vmatprep.subr.mxu1 %v608_v50 }
 0x184   : > { %656 = vmatpush1.msra.mxu1 %v607_v51 }
 0x185   : > { %657 = vmatprep.subr.mxu1 %v605_v52 }
 0x186   : > { %658 = vmatpush1.msra.mxu1 %v604_v53 }
 0x187   : > { %878 = vmatmul.mubr.msk.f32.vlgmr.msra.gmra.mxu1 %vm623_vm14, %v616_v31 }
 0x23b   : > { %v764_v55 = vpop.f32.mrf.mxu0 }
 0x23c   : > { %v765_v56 = vadd.f32 %v764_v55, %v621_v54 }
 0x23d   : > { %v934_v57 = vpop.f32.mrf.mxu0 }
 0x23e   : > { %770 = vst.msk [vmem:[%s260_s11 + $0x10] sm:$0xff] %vm623_vm14, %v765_v56 }
 0x247   : > { %v693_v58 = vpop.f32.mrf.mxu1 }
 0x248   : > { %v694_v59 = vadd.f32 %v693_v58, %v621_v54 }
 0x249   : > { %v695_v60 = vpop.f32.mrf.mxu1 }
 0x24a   : > { %768 = vst [vmem:[%s260_s11] sm:$0xff] %v694_v59  ;;  %v696_v61 = vadd.f32 %v695_v60, %v621_v54 }
 0x24c   : > { %769 = vst [vmem:[%s260_s11 + $0x8] sm:$0xff] %v696_v61 }
 0x24d PF: > { %s15_s20 = sadd.s32 1, %s1036_s20   ;;  %s1201_s18 = smov %s1032_s19 }
 0x24e   : > { %p12_p5 = scmp.ge.s32.totalorder %s15_s20, 4   ;;  %s1202_s19 = smov %s1204_s21 }
 0x250   :  { %14 = sbr.rel (!%p12_p5) target bundleno = 2 (0x2), region = 70 }

</bundles_post_ra>
